<compile_context>
chip_gen: v7x
topology: tpu7x:2x2x1
jax: 0.10.0
libtpu: 0.0.40
codegen_flags: <defaults>
</compile_context>

<pallas_src>
import functools

import jax
import jax.numpy as jnp
from jax.experimental import pallas as pl
from jax.experimental.pallas import tpu as pltpu

ROW_TILE = 512                       # row tile for the encoder-layer linears
MLM_ROW_TILE = 1024                  # bigger row tile for the vocab head (fewer weight re-reads)
MLM_LANE_TILE = 1024                 # streamed weight column-block width for the vocab head
RESIDENT_WEIGHT_BYTES = 9 << 20      # bf16 weights up to ~9 MiB stay fully VMEM-resident
VMEM_LIMIT = 32 * 1024 * 1024        # raise v5e's 16 MiB default; <= v7x's 64 MiB physical


def _round_up(x, m):
    return ((x + m - 1) // m) * m


def _pick_row_tile(total, target):
    """Largest row tile <= target that divides `total` (multiple of 8 when tiling)."""
    if total <= target:
        return total
    if total % 8:
        return total                 # single full block: always layout-legal
    t = (min(target, total) // 8) * 8
    while total % t:
        t -= 8
    return t


def _pick_lane_tile(total, target):
    """Largest lane tile <= target that divides `total` (multiple of 128 when tiling)."""
    if total <= target:
        return total
    if total % 128:
        return total
    t = (min(target, total) // 128) * 128
    while total % t:
        t -= 128
    return t


# ----------------------------- Pallas kernels ------------------------------ #

def _linear_kernel(x_ref, w_ref, b_ref, o_ref, *, activation):
    """One (tm, tn) output tile; K is contracted whole in one f32-accumulating MXU pass."""
    y = jnp.dot(x_ref[...], w_ref[...], preferred_element_type=jnp.float32)
    y = y + b_ref[...]
    if activation == "relu":
        y = jnp.maximum(y, 0.0)
    o_ref[...] = y.astype(o_ref.dtype)


def linear(x, w, b, *, activation=None, out_dtype=jnp.bfloat16,
           tm=ROW_TILE, tn=MLM_LANE_TILE):
    """y = x @ w + b (optional fused ReLU).  x:(M,K) bf16, w:(K,N) bf16, b:(1,N) f32.

    Small weights (encoder layers) are kept fully VMEM-resident (tn = N, weight DMA'd once);
    large weights (vocab head) stream 1024-wide column blocks while the x row tile stays
    resident across the inner vocab axis.
    """
    M, K = x.shape
    Kw, N = w.shape
    assert Kw == K
    tm = _pick_row_tile(M, tm)
    if K * N * w.dtype.itemsize <= RESIDENT_WEIGHT_BYTES:
        tn = N                        # fully resident weight; grid sweeps rows only
    else:
        # TODO(synk): on v5e, pipeline_mode=pl.Buffered(3) on the streamed weight spec would
        # deepen prefetch of this HBM-bound sweep.
        tn = _pick_lane_tile(N, tn)

    return pl.pallas_call(
        functools.partial(_linear_kernel, activation=activation),
        out_shape=jax.ShapeDtypeStruct((M, N), out_dtype),
        grid=(M // tm, N // tn),
        in_specs=[
            pl.BlockSpec((tm, K), lambda i, j: (i, 0)),   # resident across the inner j sweep
            pl.BlockSpec((K, tn), lambda i, j: (0, j)),   # constant when tn == N -> one DMA
            pl.BlockSpec((1, tn), lambda i, j: (0, j)),
        ],
        out_specs=pl.BlockSpec((tm, tn), lambda i, j: (i, j)),
        compiler_params=pltpu.CompilerParams(
            dimension_semantics=("parallel", "parallel"),
            vmem_limit_bytes=VMEM_LIMIT),
    )(x, w, b)


def _linear_res_ln_kernel(x_ref, w_ref, b_ref, res_ref, g_ref, bt_ref, o_ref, *, eps):
    """LayerNorm(x @ w + b + res) fused into the matmul epilogue (output features untiled)."""
    y = jnp.dot(x_ref[...], w_ref[...], preferred_element_type=jnp.float32)
    y = y + b_ref[...] + res_ref[...].astype(jnp.float32)
    mu = jnp.mean(y, axis=-1, keepdims=True)
    var = jnp.mean((y - mu) ** 2, axis=-1, keepdims=True)
    yn = (y - mu) * jax.lax.rsqrt(var + eps)
    o_ref[...] = (yn * g_ref[...] + bt_ref[...]).astype(o_ref.dtype)


def linear_add_ln(x, w, b, res, gamma, beta, *, eps=1e-5,
                  out_dtype=jnp.bfloat16, tm=ROW_TILE):
    """LayerNorm((x @ w + b) + res); LN over the output-feature axis (kept as one tile).

    Weight (K, hidden) bf16 is <= 4.5 MiB for BERT -> fully VMEM-resident, DMA'd once.
    """
    M, K = x.shape
    N = w.shape[1]
    tm = _pick_row_tile(M, tm)

    return pl.pallas_call(
        functools.partial(_linear_res_ln_kernel, eps=eps),
        out_shape=jax.ShapeDtypeStruct((M, N), out_dtype),
        grid=(M // tm,),
        in_specs=[
            pl.BlockSpec((tm, K), lambda i: (i, 0)),
            pl.BlockSpec((K, N), lambda i: (0, 0)),       # resident weight, single DMA
            pl.BlockSpec((1, N), lambda i: (0, 0)),
            pl.BlockSpec((tm, N), lambda i: (i, 0)),
            pl.BlockSpec((1, N), lambda i: (0, 0)),
            pl.BlockSpec((1, N), lambda i: (0, 0)),
        ],
        out_specs=pl.BlockSpec((tm, N), lambda i: (i, 0)),
        compiler_params=pltpu.CompilerParams(
            dimension_semantics=("parallel",),
            vmem_limit_bytes=VMEM_LIMIT),
    )(x, w, b, res, gamma, beta)


def _attn_kernel(qkv_ref, o_ref, *, num_heads, hidden, scale):
    """G attention groups per grid step: qkv block (G, L, 3H) -> output block (G, L, H)."""
    H = hidden
    dh = H // num_heads
    qkv = qkv_ref[...]                                    # (G, L, 3H) bf16, loaded once
    # TODO(synk): per-head dh-wide lane slices (dh=64 in real BERT) underfill the MXU and
    # generate masked lane copies; a head-batched (heads, L, dh) dot_general view or 2-head
    # packing would fix it, but attention is <1% of total FLOPs here (L = batch is small).
    for h in range(num_heads):                            # static unroll over heads
        q = qkv[:, :, h * dh:(h + 1) * dh] * scale        # fold 1/sqrt(dh) into q (bf16)
        k = qkv[:, :, H + h * dh:H + (h + 1) * dh]
        v = qkv[:, :, 2 * H + h * dh:2 * H + (h + 1) * dh]
        # Batched over the G group axis; contraction over dh; no materialized transpose.
        s = jnp.einsum('gld,gmd->glm', q, k,
                       preferred_element_type=jnp.float32)            # (G, L, L) f32
        s = s - jnp.max(s, axis=-1, keepdims=True)
        p = jnp.exp(s)
        p = p * pl.reciprocal(jnp.sum(p, axis=-1, keepdims=True), approx=True)
        o = jnp.einsum('glm,gmd->gld', p.astype(v.dtype), v,
                       preferred_element_type=jnp.float32)             # (G, L, dh) f32
        # Store this head's result immediately (no concat holding all heads live).
        o_ref[:, :, h * dh:(h + 1) * dh] = o.astype(o_ref.dtype)


def attention(qkv, num_heads, hidden):
    """qkv: (N, L, 3H) bf16.  L is the attended axis; N indexes independent groups."""
    Nn, L, H3 = qkv.shape
    scale = 1.0 / float(hidden // num_heads) ** 0.5
    # Groups per grid step: target >= 256 attended rows per step to amortize grid overhead.
    target = max(1, 256 // max(L, 1))
    G = min(target, Nn)
    while Nn % G:
        G -= 1
    # TODO(synk): for long attended lengths (L >= ~1024) switch to flash-style key-block
    # iteration with online-softmax scratch instead of the full (L, L) score tile.
    return pl.pallas_call(
        functools.partial(_attn_kernel, num_heads=num_heads, hidden=hidden, scale=scale),
        out_shape=jax.ShapeDtypeStruct((Nn, L, hidden), jnp.bfloat16),
        grid=(Nn // G,),
        in_specs=[pl.BlockSpec((G, L, H3), lambda n: (n, 0, 0))],
        out_specs=pl.BlockSpec((G, L, hidden), lambda n: (n, 0, 0)),
        compiler_params=pltpu.CompilerParams(dimension_semantics=("parallel",)),
    )(qkv)


# ------------------------------- Model glue -------------------------------- #

def encoder_layer(x2, p, num_heads, hidden, L, N):
    # x2: (N*L, H) bf16 with rows ordered (n, l); attention mixes across l within each n.
    qkv = linear(x2, p["in_proj_w"], p["in_proj_b"])                     # (N*L, 3H)
    ao = attention(qkv.reshape(N, L, 3 * hidden), num_heads, hidden)     # (N, L, H)
    ao = ao.reshape(N * L, hidden)
    # norm1(src + out_proj(attn)) fused into the out_proj matmul epilogue.
    x2 = linear_add_ln(ao, p["out_proj_w"], p["out_proj_b"],
                       x2, p["ln1_g"], p["ln1_b"])
    # Feed-forward: ReLU fused into ff1 epilogue; norm2(src + ffn) fused into ff2 epilogue.
    h = linear(x2, p["ff1_w"], p["ff1_b"], activation="relu")
    x2 = linear_add_ln(h, p["ff2_w"], p["ff2_b"],
                       x2, p["ln2_g"], p["ln2_b"])
    return x2


def bert_forward(params, input_ids):
    B, S = input_ids.shape
    H = params["hidden"]
    # TODO(synk): embedding gather stays in plain JAX (XLA gather); a scalar-prefetch
    # row-gather Pallas kernel is possible but not the bottleneck at these sizes.
    tok = jnp.take(params["tok_emb"], input_ids, axis=0)                 # (B, S, H) f32
    pos = params["pos_emb"][:S][None, :, :]                              # (1, S, H)
    x = (tok + pos).astype(jnp.bfloat16)
    # PyTorch batch_first=False: attention runs over axis 0 of the (B, S, H) tensor
    # (L = batch axis, groups N = seq axis).  Reorder rows ONCE to (n, l) order so every
    # attention group's L rows are contiguous; all remaining ops are row-wise.
    L, N = B, S
    x2 = x.transpose(1, 0, 2).reshape(N * L, H)
    for lp in params["layers"]:
        x2 = encoder_layer(x2, lp, params["num_heads"], H, L, N)
    # Re-order back to (b, s) rows BEFORE the vocab projection (cheap bf16 transpose) so the
    # vocab-wide f32 logits are produced directly in final layout (no logits transpose).
    x_bs = x2.reshape(N, L, H).transpose(1, 0, 2).reshape(B * S, H)
    logits = linear(x_bs, params["mlm_w"], params["mlm_b"],
                    out_dtype=jnp.float32, tm=MLM_ROW_TILE, tn=MLM_LANE_TILE)
    V = params["vocab_size"]
    # TODO(synk): the slice off the vocab padding (30720->30522) costs one logits-sized copy;
    # emitting bf16 logits or fusing the consumer would remove it.
    return logits.reshape(B, S, -1)[:, :, :V]


def init_params(key, vocab_size, hidden, num_heads, num_layers, intermediate, max_pos):
    keys = jax.random.split(key, 3 + num_layers)

    def nrm(k, shape, dtype, scale=0.02):
        return (scale * jax.random.normal(k, shape)).astype(dtype)

    # Pre-pad the vocab axis ONCE at init so the streamed MLM weight tiles cleanly
    # (no per-call 45 MiB jnp.pad).  Padded columns are zero -> padded logits are zero.
    vocab_pad = _round_up(vocab_size, MLM_LANE_TILE)
    mlm_w = jnp.pad(nrm(keys[2], (hidden, vocab_size), jnp.bfloat16),
                    ((0, 0), (0, vocab_pad - vocab_size)))

    params = {
        "num_heads": num_heads,
        "hidden": hidden,
        "vocab_size": vocab_size,
        "tok_emb": nrm(keys[0], (vocab_size, hidden), jnp.float32),
        "pos_emb": nrm(keys[1], (max_pos, hidden), jnp.float32),
        # Linear weights stored pre-transposed (in, out) in bf16; biases / LN params in f32.
        "mlm_w": mlm_w,
        "mlm_b": jnp.zeros((1, vocab_pad), jnp.float32),
        "layers": [],
    }
    for i in range(num_layers):
        lk = jax.random.split(keys[3 + i], 4)
        params["layers"].append({
            "in_proj_w": nrm(lk[0], (hidden, 3 * hidden), jnp.bfloat16),
            "in_proj_b": jnp.zeros((1, 3 * hidden), jnp.float32),
            "out_proj_w": nrm(lk[1], (hidden, hidden), jnp.bfloat16),
            "out_proj_b": jnp.zeros((1, hidden), jnp.float32),
            "ln1_g": jnp.ones((1, hidden), jnp.float32),
            "ln1_b": jnp.zeros((1, hidden), jnp.float32),
            "ff1_w": nrm(lk[2], (hidden, intermediate), jnp.bfloat16),
            "ff1_b": jnp.zeros((1, intermediate), jnp.float32),
            "ff2_w": nrm(lk[3], (intermediate, hidden), jnp.bfloat16),
            "ff2_b": jnp.zeros((1, hidden), jnp.float32),
            "ln2_g": jnp.ones((1, hidden), jnp.float32),
            "ln2_b": jnp.zeros((1, hidden), jnp.float32),
        })
    return params


if __name__ == "__main__":
    # Small, module-consistent shapes.
    vocab_size, hidden, num_heads, num_layers, intermediate = 128, 32, 4, 2, 64
    batch, seq = 2, 8

    key = jax.random.PRNGKey(0)
    pkey, ikey = jax.random.split(key)
    params = init_params(pkey, vocab_size, hidden, num_heads, num_layers,
                         intermediate, max_pos=16)
    input_ids = jax.random.randint(ikey, (batch, seq), 0, vocab_size, dtype=jnp.int32)

    logits = bert_forward(params, input_ids)
    jax.block_until_ready(logits)
    assert logits.shape == (batch, seq, vocab_size)
    assert logits.dtype == jnp.float32
    print("KERNEL_OK")
</pallas_src>

<mosaic_0001>
module attributes {stable_mosaic.version = 11 : i64} {
  func.func @_linear_kernel(%arg0: i32, %arg1: i32, %arg2: memref<16x32xbf16, #tpu.memory_space<vmem>>, %arg3: memref<32x96xbf16, #tpu.memory_space<vmem>>, %arg4: memref<1x96xf32, #tpu.memory_space<vmem>>, %arg5: memref<16x96xbf16, #tpu.memory_space<vmem>>) attributes {dimension_semantics = [#tpu.dimension_semantics<parallel>, #tpu.dimension_semantics<parallel>], iteration_bounds = array<i64: 1, 1>, scalar_prefetch = 0 : i64, scratch_operands = 0 : i64, tpu.core_type = #tpu.core_type<tc>, window_params = [{transform_indices = @transform_0, window_bounds = array<i64: 16, 32>}, {transform_indices = @transform_1, window_bounds = array<i64: 32, 96>}, {transform_indices = @transform_2, window_bounds = array<i64: 1, 96>}, {transform_indices = @transform_3, window_bounds = array<i64: 16, 96>}]} {
    %c0 = arith.constant 0 : index
    %c0_0 = arith.constant 0 : index
    %0 = vector.load %arg2[%c0, %c0_0] : memref<16x32xbf16, #tpu.memory_space<vmem>>, vector<16x32xbf16>
    %c0_1 = arith.constant 0 : index
    %c0_2 = arith.constant 0 : index
    %1 = vector.load %arg3[%c0_1, %c0_2] : memref<32x96xbf16, #tpu.memory_space<vmem>>, vector<32x96xbf16>
    %cst = arith.constant dense<0.000000e+00> : vector<16x96xf32>
    %2 = tpu.matmul %0, %1, %cst {dimension_numbers = #tpu.dot_dimension_numbers<[1], [0], [0], [1], [0, 0, 1, 1], [], []>} : vector<16x32xbf16>, vector<32x96xbf16>, vector<16x96xf32> -> vector<16x96xf32>
    %c0_3 = arith.constant 0 : index
    %c0_4 = arith.constant 0 : index
    %3 = vector.load %arg4[%c0_3, %c0_4] : memref<1x96xf32, #tpu.memory_space<vmem>>, vector<1x96xf32>
    %4 = vector.broadcast %3 : vector<1x96xf32> to vector<16x96xf32>
    %5 = arith.addf %2, %4 : vector<16x96xf32>
    %6 = arith.truncf %5 : vector<16x96xf32> to vector<16x96xbf16>
    %c0_5 = arith.constant 0 : index
    %c0_6 = arith.constant 0 : index
    %7 = vector.load %arg5[%c0_5, %c0_6] : memref<16x96xbf16, #tpu.memory_space<vmem>>, vector<16x96xbf16>
    tpu.vector_store %arg5[%c0_5, %c0_6], %6 {strides = array<i32>} : memref<16x96xbf16, #tpu.memory_space<vmem>>, vector<16x96xbf16>,
    return
  }
  func.func @transform_0(%arg0: i32, %arg1: i32) -> (i32, i32) {
    %c0_i32 = arith.constant 0 : i32
    %c0_i32_0 = arith.constant 0 : i32
    return %arg0, %c0_i32 : i32, i32
  }
  func.func @transform_1(%arg0: i32, %arg1: i32) -> (i32, i32) {
    %c0_i32 = arith.constant 0 : i32
    %c0_i32_0 = arith.constant 0 : i32
    return %c0_i32, %arg1 : i32, i32
  }
  func.func @transform_2(%arg0: i32, %arg1: i32) -> (i32, i32) {
    %c0_i32 = arith.constant 0 : i32
    %c0_i32_0 = arith.constant 0 : i32
    return %c0_i32, %arg1 : i32, i32
  }
  func.func @transform_3(%arg0: i32, %arg1: i32) -> (i32, i32) {
    %c0_i32 = arith.constant 0 : i32
    return %arg0, %arg1 : i32, i32
  }
}

</mosaic_0001>

<bundles_post_ra>
// kernel: tpu_custom_call.1
= control target key start
LH: loop header
LB: loop body
LE: loop exit
PB: predicated region body
PF: predicated region fallthrough
CT: control target
= control target key end

     0   :  { %8 = vsyncpa [#allocation3], 0  ;;  %s325_s0 = inlined_call_operand.hbm [shape: bf16[16,32], index: 0, kind: input, shape index: {}]   ;;  %s326_s1 = inlined_call_operand.hbm [shape: bf16[32,96], index: 1, kind: input, shape index: {}]   ;;  %s327_s2 = inlined_call_operand.vmem [shape: f32[1,96], index: 2, kind: input, shape index: {}]   ;;  %s328_s3 = inlined_call_operand.hbm [shape: bf16[16,96], index: 3, kind: output, shape index: {}]  }
   0x1   :  { %9 = vsyncpa [#allocation6], 0 }
   0x2   :  { %10 = vsyncpa [#allocation4], 0  ;;  %s250_s12 = smov [#allocation2]   ;;  %s178_s16 = scalar_lea.hbm %s325_s0, 128 }
   0x3   :  { %s16_s13 = sshll.u32 %s250_s12, 4  ;;  %p179_p0 = scmp.ne.s32.totalorder %s325_s0, %s178_s16  ;;  %s17_s13 = int_to_ptr.vmem [resolvable:$true] %s16_s13 }
   0x4   :  { %p182_p1 = scmp.lt.u32.totalorder %s178_s16, %s325_s0 }
   0x6   :  { %p184_p2 = pnand %p182_p1, %p179_p0 }
   0x8   :  { %187 = shalt.err (!%p184_p2)
}
   0x9   :  { %s188_s21 = scalar_lea.vmem %s17_s13, 128  ;;  %p193_p4 = scmp.lt.s32.totalorder %s17_s13, %s17_s13 }
   0xa   :  { %p189_p3 = scmp.ne.s32.totalorder %s17_s13, %s188_s21  ;;  %p194_p5 = scmp.lt.s32.totalorder %s188_s21, %s188_s21 }
   0xc   :  { %p195_p6 = por %p194_p5, %p193_p4 }
   0xe   :  { %p196_p7 = pnand %p195_p6, %p189_p3 }
  0x10   :  { %199 = shalt.err (!%p196_p7)
}
  0x11   :  { %s251_s22 = smov 64   ;;  %s252_s23 = smov 4  }
  0x12   :  { %22 = dma.hbm_to_vmem [thread:$0]  %s325_s0, 128, %s17_s13, [#allocation3], %s251_s22, %s251_s22, %s252_s23  }
  0x13   :  { %s253_s26 = smov [#allocation5]   ;;  %s200_s30 = scalar_lea.hbm %s326_s1, 256 }
  0x14   :  { %s28_s27 = sshll.u32 %s253_s26, 4  ;;  %p201_p8 = scmp.ne.s32.totalorder %s326_s1, %s200_s30  ;;  %s29_s27 = int_to_ptr.vmem [resolvable:$true] %s28_s27 }
  0x15   :  { %p204_p9 = scmp.lt.u32.totalorder %s200_s30, %s326_s1 }
  0x17   :  { %p206_p10 = pnand %p204_p9, %p201_p8 }
  0x19   :  { %209 = shalt.err (!%p206_p10)
}
  0x1a   :  { %s210_s8 = scalar_lea.vmem %s29_s27, 256  ;;  %p215_p12 = scmp.lt.s32.totalorder %s29_s27, %s29_s27 }
  0x1b   :  { %p211_p11 = scmp.ne.s32.totalorder %s29_s27, %s210_s8  ;;  %p216_p13 = scmp.lt.s32.totalorder %s210_s8, %s210_s8 }
  0x1d   :  { %p217_p0 = por %p216_p13, %p215_p12 }
  0x1f   :  { %p218_p1 = pnand %p217_p0, %p211_p11 }
  0x21   :  { %221 = shalt.err (!%p218_p1)
}
  0x22   :  { %34 = dma.hbm_to_vmem [thread:$0]  %s326_s1, 256, %s29_s27, [#allocation6], %s251_s22, %s251_s22, %s252_s23  }
  0x23   :  { %244 = dma.done.wait [#allocation3], 128  }
  0x24   :  { %245 = vsyncadd [#allocation3], 4294967168 }
  0x25   :  { %246 = dma.done.wait [#allocation6], 256  }
  0x26   :  { %247 = vsyncadd [#allocation6], 4294967040  ;;  %v254_v0 = vmov 0.0   ;;  %vm255_vm0 = vmmov 0   ;;  %v175_v1 = vld [vmem:[#allocation5] sm:$0xff]   ;;  %v176_v2 = vld [vmem:[#allocation5 + $0x8] sm:$0xff]  }
  0x27   :  { %160 = vmatprep.subr.bf16.mxu0 %v254_v0  ;;  %164 = vmatprep.mubr.msk.bf16.mxu0 %vm255_vm0, %v254_v0  ;;  %v177_v3 = vld [vmem:[#allocation2] sm:$0xff]   ;;  %vm74_vm1 = vcmask 261120   ;;  %vm127_vm2 = vcmask 781312   ;;  %s256_s1 = smov [#allocation7]  }
  0x28   :  { %161 = vmatpush3.bf16.msra.mxu0 %v175_v1  ;;  %v148_v4 = vld [vmem:[%s327_s2] ss:$0 sm:$0xff]  ;;  %s135_s12 = sshll.u32 %s256_s1, 4  ;;  %s136_s12 = int_to_ptr.vmem [resolvable:$true] %s135_s12 }
  0x29   :  { %162 = vmatprep.subr.bf16.mxu0 %v254_v0  ;;  %s222_s13 = scalar_lea.vmem %s136_s12, 128  ;;  %p227_p3 = scmp.lt.s32.totalorder %s136_s12, %s136_s12 }
  0x2a   :  { %p223_p2 = scmp.ne.s32.totalorder %s136_s12, %s222_s13  ;;  %p228_p4 = scmp.lt.s32.totalorder %s222_s13, %s222_s13 }
  0x2c   :  { %163 = vmatpush3.bf16.msra.mxu0 %v176_v2  ;;  %p229_p5 = por %p228_p4, %p227_p3 }
  0x2e   :  { %p230_p6 = pnand %p229_p5, %p223_p2 }
  0x2f   :  { %165 = vmatmul.mubr.msk.bf16.vlgmr.msra.gmra.mrb[0].mxu0 %vm74_vm1, %v177_v3 }
 0x102   :  { %v112_v5 = vpop.f32.mrb[0].mxu0 }
 0x103   :  { %v113_v6 = vadd.f32 %v148_v4, %v112_v5  ;;  %v166_v7 = vpop.f32.mrb[1].mxu0 }
 0x104   :  { %v115_v8 = vpop.f32.mrb[2].mxu0 }
 0x105   :  { %v155_v9 = vpack.c.bf16 %v113_v6, %v113_v6  ;;  %v116_v10 = vadd.f32 %v148_v4, %v115_v8  ;;  %v167_v11 = vpop.f32.mrb[3].mxu0 }
 0x107   :  { %v156_v12 = vpack.c.bf16 %v116_v10, %v116_v10  ;;  %128 = vst.msk [vmem:[#allocation7] sm:$0xf] %vm127_vm2, %v155_v9 }
 0x109   :  { %129 = vst.msk [vmem:[#allocation7 + $0x4] sm:$0xf] %vm127_vm2, %v156_v12 }
 0x10a   :  { %233 = shalt.err (!%p230_p6)
}
 0x10b   :  { %s234_s15 = scalar_lea.hbm %s328_s3, 128 }
 0x10c   :  { %p235_p7 = scmp.ne.s32.totalorder %s328_s3, %s234_s15  ;;  %p238_p8 = scmp.lt.u32.totalorder %s234_s15, %s328_s3 }
 0x10e   :  { %p240_p9 = pnand %p238_p8, %p235_p7 }
 0x110   :  { %243 = shalt.err (!%p240_p9)
}
 0x111   :  { %141 = dma.vmem_to_hbm [thread:$0]  %s136_s12, 128, %s328_s3, [#allocation4], %s251_s22, %s251_s22, %s252_s23  }
 0x112   :  { %248 = dma.done.wait [#allocation4], 128  }
 0x113   :  { %249 = vsyncadd [#allocation4], 4294967168 }
 0x114   :  { %145 = vsyncpa [#allocation3], 1 }
 0x115   :  { %146 = vsyncpa [#allocation6], 1 }
 0x116   :  { %147 = vsyncpa [#allocation4], 1 }

</bundles_post_ra>
